<compile_context>
chip_gen: v7x
topology: tpu7x:2x2x1
jax: 0.10.0
libtpu: 0.0.40
codegen_flags: <defaults>
</compile_context>

<pallas_src>
import jax
import jax.numpy as jnp
from jax.experimental import pallas as pl
from jax.experimental.pallas import tpu as pltpu


# --------------------------------------------------------------------------
# Kernel: out = relu(x @ w1 + b1) @ w2 + b2  (f32 accumulation on the MXU)
# --------------------------------------------------------------------------
def mlp_kernel(x_ref, w1_ref, b1_ref, w2_ref, b2_ref, o_ref):
    # Cast x to the matmul operand dtype in-kernel (no separate XLA cast op).
    x = x_ref[...].astype(w1_ref.dtype)
    h = jnp.dot(x, w1_ref[...], preferred_element_type=jnp.float32)
    h = h + b1_ref[...]                       # bias add in f32
    h = jnp.maximum(h, 0.0)                   # ReLU in f32
    out = jnp.dot(h.astype(w2_ref.dtype), w2_ref[...],
                  preferred_element_type=jnp.float32)
    out = out + b2_ref[...]
    o_ref[...] = out.astype(o_ref.dtype)


# --------------------------------------------------------------------------
# Helpers
# --------------------------------------------------------------------------
def _round_up(x, m):
    return (x + m - 1) // m * m


def _auto_num_batch_blocks():
    """1 batch block on single-TC chips; 2 parallel blocks on dual-TC chips."""
    try:
        kind = jax.devices()[0].device_kind.lower()
    except Exception:
        return 1
    for tag in ("v4", "v5p", "v7", "7x"):
        if tag in kind:
            return 2
    return 1


def _resident_spec(shape, single_buffer):
    """BlockSpec for a weight/bias that stays VMEM-resident across the grid."""
    idx = lambda i: (0, 0)
    if single_buffer:
        # Constant-index block: second pipeline buffer is pure VMEM waste.
        return pl.BlockSpec(shape, idx, pipeline_mode=pl.Buffered(1))
    return pl.BlockSpec(shape, idx)


def prepare_params(w1, b1, w2, b2, compute_dtype=jnp.bfloat16):
    """One-time parameter prep (do NOT call per forward).

    Weights -> compute_dtype (matmul operands), biases -> f32 (VPU adds).
    """
    return (jnp.asarray(w1, compute_dtype),
            jnp.asarray(b1, jnp.float32).reshape(1, -1),
            jnp.asarray(w2, compute_dtype),
            jnp.asarray(b2, jnp.float32).reshape(1, -1))


# --------------------------------------------------------------------------
# Forward wrapper
# --------------------------------------------------------------------------
def test_model_forward(x, params, *, block_b=None):
    """Fused forward of TestModel: linear2(relu(linear1(x))).

    x: (B, D_in); params = prepare_params(w1, b1, w2, b2) with
    w1: (D_in, H), b1: (1, H), w2: (H, D_out), b2: (1, D_out).
    """
    w1, b1, w2, b2 = params
    B, D_in = x.shape
    H = w1.shape[1]
    D_out = w2.shape[1]
    out_dtype = x.dtype

    # --- batch tiling (sublane-aligned) ------------------------------------
    if block_b is None:
        n_blocks = _auto_num_batch_blocks()
        tb = -(-B // n_blocks)            # cdiv
    else:
        tb = min(block_b, B)
    tb = _round_up(max(tb, 1), 8)         # keep second-last dim 8-aligned
    Bp = _round_up(B, tb)
    xp = jnp.pad(x, ((0, Bp - B), (0, 0))) if Bp != B else x
    grid = (Bp // tb,)

    flops = 2 * Bp * (D_in * H + H * D_out)
    bytes_accessed = (xp.size * xp.dtype.itemsize
                      + w1.size * w1.dtype.itemsize
                      + w2.size * w2.dtype.itemsize
                      + b1.size * 4 + b2.size * 4
                      + Bp * D_out * jnp.dtype(out_dtype).itemsize)

    def run(single_buffer):
        in_specs = [
            pl.BlockSpec((tb, D_in), lambda i: (i, 0)),      # x tiles stream
            _resident_spec((D_in, H), single_buffer),        # w1 resident
            _resident_spec((1, H), single_buffer),           # b1 resident
            _resident_spec((H, D_out), single_buffer),       # w2 resident
            _resident_spec((1, D_out), single_buffer),       # b2 resident
        ]
        return pl.pallas_call(
            mlp_kernel,
            out_shape=jax.ShapeDtypeStruct((Bp, D_out), out_dtype),
            grid=grid,
            in_specs=in_specs,
            out_specs=pl.BlockSpec((tb, D_out), lambda i: (i, 0)),
            compiler_params=pltpu.CompilerParams(
                dimension_semantics=("parallel",)),
            cost_estimate=pl.CostEstimate(
                flops=flops, transcendentals=0,
                bytes_accessed=bytes_accessed),
        )(xp, w1, b1, w2, b2)

    try:
        out = run(single_buffer=True)
    except Exception:
        # Older Pallas without Buffered(1) support for resident blocks.
        out = run(single_buffer=False)

    return out[:B] if Bp != B else out


# --------------------------------------------------------------------------
# Deterministic init mimicking torch.nn.Linear defaults (U(+-1/sqrt(fan_in)))
# --------------------------------------------------------------------------
def init_params(key, input_dim, output_dim, dtype=jnp.float32):
    hidden = input_dim * 4
    k1, k2, k3, k4 = jax.random.split(key, 4)

    bound1 = 1.0 / jnp.sqrt(input_dim)
    w1 = jax.random.uniform(k1, (input_dim, hidden), dtype,
                            minval=-bound1, maxval=bound1)   # stored (in, out)
    b1 = jax.random.uniform(k2, (1, hidden), dtype,
                            minval=-bound1, maxval=bound1)

    bound2 = 1.0 / jnp.sqrt(hidden)
    w2 = jax.random.uniform(k3, (hidden, output_dim), dtype,
                            minval=-bound2, maxval=bound2)
    b2 = jax.random.uniform(k4, (1, output_dim), dtype,
                            minval=-bound2, maxval=bound2)
    return w1, b1, w2, b2


if __name__ == "__main__":
    key = jax.random.PRNGKey(0)
    k_x, k_p = jax.random.split(key)

    batch = 64           # small; still exercises the 2-block grid on dual-TC
    input_dim = 32       # hidden = 4 * input_dim = 128
    output_dim = 32

    x = jax.random.normal(k_x, (batch, input_dim), jnp.float32)
    w1, b1, w2, b2 = init_params(k_p, input_dim, output_dim)

    # Pure-JAX f32 reference.
    ref = jnp.maximum(x @ w1 + b1, 0.0) @ w2 + b2

    # Fast path: bf16 matmul operands, f32 accumulation.
    params_bf16 = prepare_params(w1, b1, w2, b2, compute_dtype=jnp.bfloat16)
    out_bf16 = jax.block_until_ready(test_model_forward(x, params_bf16))
    assert out_bf16.shape == (batch, output_dim)
    assert jnp.allclose(out_bf16, ref, atol=5e-2, rtol=5e-2), \
        "bf16 path mismatch vs f32 reference"

    # Strict path: f32 matmul operands, tight tolerance.
    params_f32 = prepare_params(w1, b1, w2, b2, compute_dtype=jnp.float32)
    out_f32 = jax.block_until_ready(test_model_forward(x, params_f32))
    assert jnp.allclose(out_f32, ref, atol=1e-5, rtol=1e-5), \
        "f32 path mismatch vs f32 reference"

    # Ragged batch: exercises batch padding + explicit multi-block grid.
    x_odd = x[:37]
    out_odd = jax.block_until_ready(
        test_model_forward(x_odd, params_f32, block_b=24))
    assert out_odd.shape == (37, output_dim)
    assert jnp.allclose(out_odd, ref[:37], atol=1e-5, rtol=1e-5), \
        "ragged-batch path mismatch vs f32 reference"

    print("KERNEL_OK")
</pallas_src>

<mosaic_0001>
module attributes {stable_mosaic.version = 11 : i64} {
  func.func @mlp_kernel(%arg0: i32, %arg1: memref<64x32xf32, #tpu.memory_space<vmem>>, %arg2: memref<32x128xbf16, #tpu.memory_space<vmem>>, %arg3: memref<1x128xf32, #tpu.memory_space<vmem>>, %arg4: memref<128x32xbf16, #tpu.memory_space<vmem>>, %arg5: memref<1x32xf32, #tpu.memory_space<vmem>>, %arg6: memref<64x32xf32, #tpu.memory_space<vmem>>) attributes {dimension_semantics = [#tpu.dimension_semantics<parallel>], iteration_bounds = array<i64: 1>, scalar_prefetch = 0 : i64, scratch_operands = 0 : i64, tpu.core_type = #tpu.core_type<tc>, window_params = [{transform_indices = @transform_0, window_bounds = array<i64: 64, 32>}, {pipeline_mode = #tpu.pipeline_mode<synchronous>, transform_indices = @transform_1, window_bounds = array<i64: 32, 128>}, {pipeline_mode = #tpu.pipeline_mode<synchronous>, transform_indices = @transform_2, window_bounds = array<i64: 1, 128>}, {pipeline_mode = #tpu.pipeline_mode<synchronous>, transform_indices = @transform_3, window_bounds = array<i64: 128, 32>}, {pipeline_mode = #tpu.pipeline_mode<synchronous>, transform_indices = @transform_4, window_bounds = array<i64: 1, 32>}, {transform_indices = @transform_5, window_bounds = array<i64: 64, 32>}]} {
    %c0 = arith.constant 0 : index
    %c0_0 = arith.constant 0 : index
    %0 = vector.load %arg1[%c0, %c0_0] : memref<64x32xf32, #tpu.memory_space<vmem>>, vector<64x32xf32>
    %1 = arith.truncf %0 : vector<64x32xf32> to vector<64x32xbf16>
    %c0_1 = arith.constant 0 : index
    %c0_2 = arith.constant 0 : index
    %2 = vector.load %arg2[%c0_1, %c0_2] : memref<32x128xbf16, #tpu.memory_space<vmem>>, vector<32x128xbf16>
    %cst = arith.constant dense<0.000000e+00> : vector<64x128xf32>
    %3 = tpu.matmul %1, %2, %cst {dimension_numbers = #tpu.dot_dimension_numbers<[1], [0], [0], [1], [0, 0, 1, 1], [], []>} : vector<64x32xbf16>, vector<32x128xbf16>, vector<64x128xf32> -> vector<64x128xf32>
    %c0_3 = arith.constant 0 : index
    %c0_4 = arith.constant 0 : index
    %4 = vector.load %arg3[%c0_3, %c0_4] : memref<1x128xf32, #tpu.memory_space<vmem>>, vector<1x128xf32>
    %5 = vector.broadcast %4 : vector<1x128xf32> to vector<64x128xf32>
    %6 = arith.addf %3, %5 : vector<64x128xf32>
    %cst_5 = arith.constant 0.000000e+00 : f32
    %7 = vector.broadcast %cst_5 : f32 to vector<64x128xf32>
    %8 = arith.maximumf %6, %7 : vector<64x128xf32>
    %9 = arith.truncf %8 : vector<64x128xf32> to vector<64x128xbf16>
    %c0_6 = arith.constant 0 : index
    %c0_7 = arith.constant 0 : index
    %10 = vector.load %arg4[%c0_6, %c0_7] : memref<128x32xbf16, #tpu.memory_space<vmem>>, vector<128x32xbf16>
    %cst_8 = arith.constant dense<0.000000e+00> : vector<64x32xf32>
    %11 = tpu.matmul %9, %10, %cst_8 {dimension_numbers = #tpu.dot_dimension_numbers<[1], [0], [0], [1], [0, 0, 1, 1], [], []>} : vector<64x128xbf16>, vector<128x32xbf16>, vector<64x32xf32> -> vector<64x32xf32>
    %c0_9 = arith.constant 0 : index
    %c0_10 = arith.constant 0 : index
    %12 = vector.load %arg5[%c0_9, %c0_10] : memref<1x32xf32, #tpu.memory_space<vmem>>, vector<1x32xf32>
    %13 = vector.broadcast %12 : vector<1x32xf32> to vector<64x32xf32>
    %14 = arith.addf %11, %13 : vector<64x32xf32>
    %c0_11 = arith.constant 0 : index
    %c0_12 = arith.constant 0 : index
    %15 = vector.load %arg6[%c0_11, %c0_12] : memref<64x32xf32, #tpu.memory_space<vmem>>, vector<64x32xf32>
    tpu.vector_store %arg6[%c0_11, %c0_12], %14 {strides = array<i32>} : memref<64x32xf32, #tpu.memory_space<vmem>>, vector<64x32xf32>,
    return
  }
  func.func @transform_0(%arg0: i32) -> (i32, i32) {
    %c0_i32 = arith.constant 0 : i32
    %c0_i32_0 = arith.constant 0 : i32
    return %arg0, %c0_i32 : i32, i32
  }
  func.func @transform_1(%arg0: i32) -> (i32, i32) {
    %c0_i32 = arith.constant 0 : i32
    %c0_i32_0 = arith.constant 0 : i32
    %c0_i32_1 = arith.constant 0 : i32
    return %c0_i32, %c0_i32_0 : i32, i32
  }
  func.func @transform_2(%arg0: i32) -> (i32, i32) {
    %c0_i32 = arith.constant 0 : i32
    %c0_i32_0 = arith.constant 0 : i32
    %c0_i32_1 = arith.constant 0 : i32
    return %c0_i32, %c0_i32_0 : i32, i32
  }
  func.func @transform_3(%arg0: i32) -> (i32, i32) {
    %c0_i32 = arith.constant 0 : i32
    %c0_i32_0 = arith.constant 0 : i32
    %c0_i32_1 = arith.constant 0 : i32
    return %c0_i32, %c0_i32_0 : i32, i32
  }
  func.func @transform_4(%arg0: i32) -> (i32, i32) {
    %c0_i32 = arith.constant 0 : i32
    %c0_i32_0 = arith.constant 0 : i32
    %c0_i32_1 = arith.constant 0 : i32
    return %c0_i32, %c0_i32_0 : i32, i32
  }
  func.func @transform_5(%arg0: i32) -> (i32, i32) {
    %c0_i32 = arith.constant 0 : i32
    %c0_i32_0 = arith.constant 0 : i32
    return %arg0, %c0_i32 : i32, i32
  }
}

module attributes {stable_mosaic.version = 11 : i64} {
  func.func @mlp_kernel(%arg0: i32, %arg1: memref<64x32xf32, #tpu.memory_space<vmem>>, %arg2: memref<32x128xbf16, #tpu.memory_space<vmem>>, %arg3: memref<1x128xf32, #tpu.memory_space<vmem>>, %arg4: memref<128x32xbf16, #tpu.memory_space<vmem>>, %arg5: memref<1x32xf32, #tpu.memory_space<vmem>>, %arg6: memref<64x32xf32, #tpu.memory_space<vmem>>) attributes {dimension_semantics = [#tpu.dimension_semantics<parallel>], iteration_bounds = array<i64: 1>, scalar_prefetch = 0 : i64, scratch_operands = 0 : i64, tpu.core_type = #tpu.core_type<tc>, window_params = [{transform_indices = @transform_0, window_bounds = array<i64: 64, 32>}, {pipeline_mode = #tpu.pipeline_mode<synchronous>, transform_indices = @transform_1, window_bounds = array<i64: 32, 128>}, {pipeline_mode = #tpu.pipeline_mode<synchronous>, transform_indices = @transform_2, window_bounds = array<i64: 1, 128>}, {pipeline_mode = #tpu.pipeline_mode<synchronous>, transform_indices = @transform_3, window_bounds = array<i64: 128, 32>}, {pipeline_mode = #tpu.pipeline_mode<synchronous>, transform_indices = @transform_4, window_bounds = array<i64: 1, 32>}, {transform_indices = @transform_5, window_bounds = array<i64: 64, 32>}]} {
    %c0 = arith.constant 0 : index
    %c0_0 = arith.constant 0 : index
    %0 = vector.load %arg1[%c0, %c0_0] : memref<64x32xf32, #tpu.memory_space<vmem>>, vector<64x32xf32>
    %1 = arith.truncf %0 : vector<64x32xf32> to vector<64x32xbf16>
    %c0_1 = arith.constant 0 : index
    %c0_2 = arith.constant 0 : index
    %2 = vector.load %arg2[%c0_1, %c0_2] : memref<32x128xbf16, #tpu.memory_space<vmem>>, vector<32x128xbf16>
    %cst = arith.constant dense<0.000000e+00> : vector<64x128xf32>
    %3 = tpu.matmul %1, %2, %cst {dimension_numbers = #tpu.dot_dimension_numbers<[1], [0], [0], [1], [0, 0, 1, 1], [], []>} : vector<64x32xbf16>, vector<32x128xbf16>, vector<64x128xf32> -> vector<64x128xf32>
    %c0_3 = arith.constant 0 : index
    %c0_4 = arith.constant 0 : index
    %4 = vector.load %arg3[%c0_3, %c0_4] : memref<1x128xf32, #tpu.memory_space<vmem>>, vector<1x128xf32>
    %5 = vector.broadcast %4 : vector<1x128xf32> to vector<64x128xf32>
    %6 = arith.addf %3, %5 : vector<64x128xf32>
    %cst_5 = arith.constant 0.000000e+00 : f32
    %7 = vector.broadcast %cst_5 : f32 to vector<64x128xf32>
    %8 = arith.maximumf %6, %7 : vector<64x128xf32>
    %9 = arith.truncf %8 : vector<64x128xf32> to vector<64x128xbf16>
    %c0_6 = arith.constant 0 : index
    %c0_7 = arith.constant 0 : index
    %10 = vector.load %arg4[%c0_6, %c0_7] : memref<128x32xbf16, #tpu.memory_space<vmem>>, vector<128x32xbf16>
    %cst_8 = arith.constant dense<0.000000e+00> : vector<64x32xf32>
    %11 = tpu.matmul %9, %10, %cst_8 {dimension_numbers = #tpu.dot_dimension_numbers<[1], [0], [0], [1], [0, 0, 1, 1], [], []>} : vector<64x128xbf16>, vector<128x32xbf16>, vector<64x32xf32> -> vector<64x32xf32>
    %c0_9 = arith.constant 0 : index
    %c0_10 = arith.constant 0 : index
    %12 = vector.load %arg5[%c0_9, %c0_10] : memref<1x32xf32, #tpu.memory_space<vmem>>, vector<1x32xf32>
    %13 = vector.broadcast %12 : vector<1x32xf32> to vector<64x32xf32>
    %14 = arith.addf %11, %13 : vector<64x32xf32>
    %c0_11 = arith.constant 0 : index
    %c0_12 = arith.constant 0 : index
    %15 = vector.load %arg6[%c0_11, %c0_12] : memref<64x32xf32, #tpu.memory_space<vmem>>, vector<64x32xf32>
    tpu.vector_store %arg6[%c0_11, %c0_12], %14 {strides = array<i32>} : memref<64x32xf32, #tpu.memory_space<vmem>>, vector<64x32xf32>,
    return
  }
  func.func @transform_0(%arg0: i32) -> (i32, i32) {
    %c0_i32 = arith.constant 0 : i32
    %c0_i32_0 = arith.constant 0 : i32
    return %arg0, %c0_i32 : i32, i32
  }
  func.func @transform_1(%arg0: i32) -> (i32, i32) {
    %c0_i32 = arith.constant 0 : i32
    %c0_i32_0 = arith.constant 0 : i32
    %c0_i32_1 = arith.constant 0 : i32
    return %c0_i32, %c0_i32_0 : i32, i32
  }
  func.func @transform_2(%arg0: i32) -> (i32, i32) {
    %c0_i32 = arith.constant 0 : i32
    %c0_i32_0 = arith.constant 0 : i32
    %c0_i32_1 = arith.constant 0 : i32
    return %c0_i32, %c0_i32_0 : i32, i32
  }
  func.func @transform_3(%arg0: i32) -> (i32, i32) {
    %c0_i32 = arith.constant 0 : i32
    %c0_i32_0 = arith.constant 0 : i32
    %c0_i32_1 = arith.constant 0 : i32
    return %c0_i32, %c0_i32_0 : i32, i32
  }
  func.func @transform_4(%arg0: i32) -> (i32, i32) {
    %c0_i32 = arith.constant 0 : i32
    %c0_i32_0 = arith.constant 0 : i32
    %c0_i32_1 = arith.constant 0 : i32
    return %c0_i32, %c0_i32_0 : i32, i32
  }
  func.func @transform_5(%arg0: i32) -> (i32, i32) {
    %c0_i32 = arith.constant 0 : i32
    %c0_i32_0 = arith.constant 0 : i32
    return %arg0, %c0_i32 : i32, i32
  }
}

</mosaic_0001>

<bundles_post_ra>
// kernel: tpu_custom_call.1
= control target key start
LH: loop header
LB: loop body
LE: loop exit
PB: predicated region body
PF: predicated region fallthrough
CT: control target
= control target key end

     0   :  { %vm56_vm0 = vcmask 261120   ;;  %s500_s1 = inlined_call_operand.vmem [shape: bf16[32,128], index: 1, kind: input, shape index: {}]   ;;  %s501_s0 = inlined_call_operand.vmem [shape: f32[64,32], index: 0, kind: input, shape index: {}]   ;;  %s502_s3 = inlined_call_operand.vmem [shape: bf16[128,32], index: 3, kind: input, shape index: {}]   ;;  %s503_s2 = inlined_call_operand.vmem [shape: f32[1,128], index: 2, kind: input, shape index: {}]   ;;  %s504_s4 = inlined_call_operand.vmem [shape: f32[1,32], index: 4, kind: input, shape index: {}]   ;;  %s505_s5 = inlined_call_operand.vmem [shape: f32[64,32], index: 5, kind: output, shape index: {}]  }
   0x1   :  { %v364_v0 = vld [vmem:[%s500_s1] sm:$0xff]   ;;  %v365_v1 = vld [vmem:[%s500_s1 + $0x8] sm:$0xff]   ;;  %v23_v5 = vld [vmem:[%s501_s0 + $0x10] sm:$0xff] }
   0x2   :  { %328 = vmatprep.subr.bf16.mxu0 %v364_v0  ;;  %v21_v2 = vld [vmem:[%s501_s0] sm:$0xff]  ;;  %v22_v3 = vld [vmem:[%s501_s0 + $0x8] sm:$0xff]  ;;  %v24_v6 = vld [vmem:[%s501_s0 + $0x18] sm:$0xff] }
   0x3   :  { %329 = vmatpush3.bf16.msra.mxu0 %v364_v0  ;;  %v29_v4 = vpack.c.bf16 %v22_v3, %v21_v2  ;;  %v25_v7 = vld [vmem:[%s501_s0 + $0x20] sm:$0xff]  ;;  %v26_v8 = vld [vmem:[%s501_s0 + $0x28] sm:$0xff]  ;;  %v30_v10 = vpack.c.bf16 %v24_v6, %v23_v5  ;;  %v27_v13 = vld [vmem:[%s501_s0 + $0x30] sm:$0xff] }
   0x4   :  { %330 = vmatprep.subr.bf16.mxu0 %v365_v1  ;;  %v366_v9 = vld [vmem:[%s502_s3] sm:$0xff]   ;;  %v367_v11 = vld [vmem:[%s502_s3 + $0x8] sm:$0xff]   ;;  %v31_v12 = vpack.c.bf16 %v26_v8, %v25_v7  ;;  %v368_v14 = vld [vmem:[%s502_s3 + $0x10] sm:$0xff]  }
   0x5   :  { %332 = vmatprep.mubr.msk.bf16.mxu0 %vm56_vm0, %v29_v4  ;;  %340 = vmatprep.subr.bf16.mxu1 %v366_v9  ;;  %v28_v15 = vld [vmem:[%s501_s0 + $0x38] sm:$0xff]  ;;  %v370_v18 = vld [vmem:[%s502_s3 + $0x20] sm:$0xff]   ;;  %v371_v19 = vld [vmem:[%s502_s3 + $0x28] sm:$0xff]  }
   0x6   :  { %341 = vmatpush3.bf16.msra.mxu1 %v366_v9  ;;  %v369_v16 = vld [vmem:[%s502_s3 + $0x18] sm:$0xff]   ;;  %v32_v17 = vpack.c.bf16 %v28_v15, %v27_v13  ;;  %v372_v20 = vld [vmem:[%s502_s3 + $0x30] sm:$0xff]   ;;  %v294_v22 = vld [vmem:[%s503_s2] ss:$0 sm:$0xff] }
   0x7   :  { %331 = vmatpush3.bf16.msra.mxu0 %v365_v1  ;;  %342 = vmatprep.subr.bf16.mxu1 %v367_v11  ;;  %v373_v21 = vld [vmem:[%s502_s3 + $0x38] sm:$0xff]   ;;  %v301_v51 = vld [vmem:[%s504_s4] ss:$0 sm:$0xff] }
   0xa   :  { %333 = vmatmul.mubr.msk.bf16.vlgmr.msra.gmra.mrb[0].mxu0 %vm56_vm0, %v30_v10  ;;  %343 = vmatpush3.bf16.msra.mxu1 %v367_v11 }
   0xb   :  { %336 = vmatprep.mubr.msk.bf16.mxu0 %vm56_vm0, %v31_v12  ;;  %344 = vmatprep.subr.bf16.mxu1 %v368_v14 }
   0xe   :  { %345 = vmatpush3.bf16.msra.mxu1 %v368_v14 }
   0xf   :  { %346 = vmatprep.subr.bf16.mxu1 %v369_v16 }
  0x12   :  { %337 = vmatmul.mubr.msk.bf16.gmra.mrb[4].mxu0 %vm56_vm0, %v32_v17  ;;  %347 = vmatpush3.bf16.msra.mxu1 %v369_v16 }
  0x13   :  { %348 = vmatprep.subr.bf16.mxu1 %v370_v18 }
  0x16   :  { %349 = vmatpush3.bf16.msra.mxu1 %v370_v18 }
  0x17   :  { %350 = vmatprep.subr.bf16.mxu1 %v371_v19 }
  0x1a   :  { %351 = vmatpush3.bf16.msra.mxu1 %v371_v19 }
  0x1b   :  { %352 = vmatprep.subr.bf16.mxu1 %v372_v20 }
  0x1e   :  { %353 = vmatpush3.bf16.msra.mxu1 %v372_v20 }
  0x1f   :  { %354 = vmatprep.subr.bf16.mxu1 %v373_v21 }
  0x22   :  { %355 = vmatpush3.bf16.msra.mxu1 %v373_v21 }
  0xdd   :  { %v334_v23 = vpop.f32.mrb[0].mxu0 }
  0xde   :  { %v112_v24 = vadd.f32 %v334_v23, %v294_v22  ;;  %v103_v25 = vpop.f32.mrb[1].mxu0 }
  0xdf   :  { %v104_v26 = vadd.f32 %v294_v22, %v103_v25  ;;  %v335_v27 = vpop.f32.mrb[2].mxu0 }
  0xe0   :  { %v115_v28 = vadd.f32 %v335_v27, %v294_v22  ;;  %v106_v29 = vpop.f32.mrb[3].mxu0  ;;  %v136_v31 = vmax.f32 %v112_v24, 0.0 }
  0xe1   :  { %v107_v30 = vadd.f32 %v294_v22, %v106_v29  ;;  %v134_v33 = vmax.f32 %v104_v26, 0.0 }
  0xe2   :  { %v137_v32 = vmax.f32 %v115_v28, 0.0 }
  0xe3   :  { %v135_v34 = vmax.f32 %v107_v30, 0.0 }
  0xe4   :  { %v143_v35 = vpack.c.bf16 %v137_v32, %v136_v31 }
  0xe5   :  { %v338_v36 = vpop.f32.mrb[4].mxu0  ;;  %v142_v37 = vpack.c.bf16 %v135_v34, %v134_v33 }
  0xe6   :  { %v128_v38 = vadd.f32 %v338_v36, %v294_v22  ;;  %v119_v39 = vpop.f32.mrb[5].mxu0 }
  0xe7   :  { %v120_v40 = vadd.f32 %v294_v22, %v119_v39  ;;  %v339_v41 = vpop.f32.mrb[6].mxu0  ;;  %356 = vmatprep.mubr.bf16.mxu1 %v142_v37 }
  0xe8   :  { %v131_v42 = vadd.f32 %v339_v41, %v294_v22  ;;  %v122_v43 = vpop.f32.mrb[7].mxu0  ;;  %357 = vmatmul.mubr.bf16.vlgmr.msra.gmra.mrb[0].mxu1 %v143_v35  ;;  %v140_v45 = vmax.f32 %v128_v38, 0.0 }
  0xe9   :  { %v123_v44 = vadd.f32 %v294_v22, %v122_v43  ;;  %v138_v47 = vmax.f32 %v120_v40, 0.0 }
  0xea   :  { %v141_v46 = vmax.f32 %v131_v42, 0.0 }
  0xeb   :  { %v139_v48 = vmax.f32 %v123_v44, 0.0 }
  0xec   :  { %v145_v49 = vpack.c.bf16 %v141_v46, %v140_v45 }
  0xed   :  { %v144_v50 = vpack.c.bf16 %v139_v48, %v138_v47 }
  0xef   :  { %360 = vmatprep.mubr.bf16.mxu1 %v144_v50 }
  0xf0   :  { %361 = vmatmul.mubr.bf16.gmra.mrb[4].mxu1 %v145_v49 }
 0x1bb   :  { %v358_v52 = vpop.f32.mrb[0].mxu1 }
 0x1bc   :  { %v260_v53 = vadd.f32 %v358_v52, %v301_v51  ;;  %v251_v54 = vpop.f32.mrb[1].mxu1 }
 0x1bd   :  { %v252_v55 = vadd.f32 %v301_v51, %v251_v54  ;;  %v359_v56 = vpop.f32.mrb[2].mxu1 }
 0x1be   :  { %284 = vst.msk [vmem:[%s505_s5 + $0x10] sm:$0xff] %vm56_vm0, %v260_v53  ;;  %v263_v57 = vadd.f32 %v359_v56, %v301_v51  ;;  %v254_v58 = vpop.f32.mrb[3].mxu1 }
 0x1bf   :  { %282 = vst.msk [vmem:[%s505_s5] sm:$0xff] %vm56_vm0, %v252_v55  ;;  %v255_v59 = vadd.f32 %v301_v51, %v254_v58 }
 0x1c0   :  { %285 = vst.msk [vmem:[%s505_s5 + $0x18] sm:$0xff] %vm56_vm0, %v263_v57 }
 0x1c1   :  { %283 = vst.msk [vmem:[%s505_s5 + $0x8] sm:$0xff] %vm56_vm0, %v255_v59 }
 0x1c3   :  { %v362_v60 = vpop.f32.mrb[4].mxu1 }
 0x1c4   :  { %v276_v61 = vadd.f32 %v362_v60, %v301_v51  ;;  %v267_v62 = vpop.f32.mrb[5].mxu1 }
 0x1c5   :  { %v268_v63 = vadd.f32 %v301_v51, %v267_v62  ;;  %v363_v0 = vpop.f32.mrb[6].mxu1 }
 0x1c6   :  { %288 = vst.msk [vmem:[%s505_s5 + $0x30] sm:$0xff] %vm56_vm0, %v276_v61  ;;  %v279_v1 = vadd.f32 %v363_v0, %v301_v51  ;;  %v270_v2 = vpop.f32.mrb[7].mxu1 }
 0x1c7   :  { %286 = vst.msk [vmem:[%s505_s5 + $0x20] sm:$0xff] %vm56_vm0, %v268_v63  ;;  %v271_v3 = vadd.f32 %v301_v51, %v270_v2 }
 0x1c8   :  { %289 = vst.msk [vmem:[%s505_s5 + $0x38] sm:$0xff] %vm56_vm0, %v279_v1 }
 0x1c9   :  { %287 = vst.msk [vmem:[%s505_s5 + $0x28] sm:$0xff] %vm56_vm0, %v271_v3 }

// kernel: tpu_custom_call.1
= control target key start
LH: loop header
LB: loop body
LE: loop exit
PB: predicated region body
PF: predicated region fallthrough
CT: control target
= control target key end

     0   :  { %vm56_vm0 = vcmask 261120   ;;  %s500_s1 = inlined_call_operand.vmem [shape: bf16[32,128], index: 1, kind: input, shape index: {}]   ;;  %s501_s0 = inlined_call_operand.vmem [shape: f32[64,32], index: 0, kind: input, shape index: {}]   ;;  %s502_s3 = inlined_call_operand.vmem [shape: bf16[128,32], index: 3, kind: input, shape index: {}]   ;;  %s503_s2 = inlined_call_operand.vmem [shape: f32[1,128], index: 2, kind: input, shape index: {}]   ;;  %s504_s4 = inlined_call_operand.vmem [shape: f32[1,32], index: 4, kind: input, shape index: {}]   ;;  %s505_s5 = inlined_call_operand.vmem [shape: f32[64,32], index: 5, kind: output, shape index: {}]  }
   0x1   :  { %v364_v0 = vld [vmem:[%s500_s1] sm:$0xff]   ;;  %v365_v1 = vld [vmem:[%s500_s1 + $0x8] sm:$0xff]   ;;  %v23_v5 = vld [vmem:[%s501_s0 + $0x10] sm:$0xff] }
   0x2   :  { %328 = vmatprep.subr.bf16.mxu0 %v364_v0  ;;  %v21_v2 = vld [vmem:[%s501_s0] sm:$0xff]  ;;  %v22_v3 = vld [vmem:[%s501_s0 + $0x8] sm:$0xff]  ;;  %v24_v6 = vld [vmem:[%s501_s0 + $0x18] sm:$0xff] }
   0x3   :  { %329 = vmatpush3.bf16.msra.mxu0 %v364_v0  ;;  %v29_v4 = vpack.c.bf16 %v22_v3, %v21_v2  ;;  %v25_v7 = vld [vmem:[%s501_s0 + $0x20] sm:$0xff]  ;;  %v26_v8 = vld [vmem:[%s501_s0 + $0x28] sm:$0xff]  ;;  %v30_v10 = vpack.c.bf16 %v24_v6, %v23_v5  ;;  %v27_v13 = vld [vmem:[%s501_s0 + $0x30] sm:$0xff] }
   0x4   :  { %330 = vmatprep.subr.bf16.mxu0 %v365_v1  ;;  %v366_v9 = vld [vmem:[%s502_s3] sm:$0xff]   ;;  %v367_v11 = vld [vmem:[%s502_s3 + $0x8] sm:$0xff]   ;;  %v31_v12 = vpack.c.bf16 %v26_v8, %v25_v7  ;;  %v368_v14 = vld [vmem:[%s502_s3 + $0x10] sm:$0xff]  }
   0x5   :  { %332 = vmatprep.mubr.msk.bf16.mxu0 %vm56_vm0, %v29_v4  ;;  %340 = vmatprep.subr.bf16.mxu1 %v366_v9  ;;  %v28_v15 = vld [vmem:[%s501_s0 + $0x38] sm:$0xff]  ;;  %v370_v18 = vld [vmem:[%s502_s3 + $0x20] sm:$0xff]   ;;  %v371_v19 = vld [vmem:[%s502_s3 + $0x28] sm:$0xff]  }
   0x6   :  { %341 = vmatpush3.bf16.msra.mxu1 %v366_v9  ;;  %v369_v16 = vld [vmem:[%s502_s3 + $0x18] sm:$0xff]   ;;  %v32_v17 = vpack.c.bf16 %v28_v15, %v27_v13  ;;  %v372_v20 = vld [vmem:[%s502_s3 + $0x30] sm:$0xff]   ;;  %v294_v22 = vld [vmem:[%s503_s2] ss:$0 sm:$0xff] }
   0x7   :  { %331 = vmatpush3.bf16.msra.mxu0 %v365_v1  ;;  %342 = vmatprep.subr.bf16.mxu1 %v367_v11  ;;  %v373_v21 = vld [vmem:[%s502_s3 + $0x38] sm:$0xff]   ;;  %v301_v51 = vld [vmem:[%s504_s4] ss:$0 sm:$0xff] }
   0xa   :  { %333 = vmatmul.mubr.msk.bf16.vlgmr.msra.gmra.mrb[0].mxu0 %vm56_vm0, %v30_v10  ;;  %343 = vmatpush3.bf16.msra.mxu1 %v367_v11 }
   0xb   :  { %336 = vmatprep.mubr.msk.bf16.mxu0 %vm56_vm0, %v31_v12  ;;  %344 = vmatprep.subr.bf16.mxu1 %v368_v14 }
   0xe   :  { %345 = vmatpush3.bf16.msra.mxu1 %v368_v14 }
   0xf   :  { %346 = vmatprep.subr.bf16.mxu1 %v369_v16 }
  0x12   :  { %337 = vmatmul.mubr.msk.bf16.gmra.mrb[4].mxu0 %vm56_vm0, %v32_v17  ;;  %347 = vmatpush3.bf16.msra.mxu1 %v369_v16 }
  0x13   :  { %348 = vmatprep.subr.bf16.mxu1 %v370_v18 }
  0x16   :  { %349 = vmatpush3.bf16.msra.mxu1 %v370_v18 }
  0x17   :  { %350 = vmatprep.subr.bf16.mxu1 %v371_v19 }
  0x1a   :  { %351 = vmatpush3.bf16.msra.mxu1 %v371_v19 }
  0x1b   :  { %352 = vmatprep.subr.bf16.mxu1 %v372_v20 }
  0x1e   :  { %353 = vmatpush3.bf16.msra.mxu1 %v372_v20 }
  0x1f   :  { %354 = vmatprep.subr.bf16.mxu1 %v373_v21 }
  0x22   :  { %355 = vmatpush3.bf16.msra.mxu1 %v373_v21 }
  0xdd   :  { %v334_v23 = vpop.f32.mrb[0].mxu0 }
  0xde   :  { %v112_v24 = vadd.f32 %v334_v23, %v294_v22  ;;  %v103_v25 = vpop.f32.mrb[1].mxu0 }
  0xdf   :  { %v104_v26 = vadd.f32 %v294_v22, %v103_v25  ;;  %v335_v27 = vpop.f32.mrb[2].mxu0 }
  0xe0   :  { %v115_v28 = vadd.f32 %v335_v27, %v294_v22  ;;  %v106_v29 = vpop.f32.mrb[3].mxu0  ;;  %v136_v31 = vmax.f32 %v112_v24, 0.0 }
  0xe1   :  { %v107_v30 = vadd.f32 %v294_v22, %v106_v29  ;;  %v134_v33 = vmax.f32 %v104_v26, 0.0 }
  0xe2   :  { %v137_v32 = vmax.f32 %v115_v28, 0.0 }
  0xe3   :  { %v135_v34 = vmax.f32 %v107_v30, 0.0 }
  0xe4   :  { %v143_v35 = vpack.c.bf16 %v137_v32, %v136_v31 }
  0xe5   :  { %v338_v36 = vpop.f32.mrb[4].mxu0  ;;  %v142_v37 = vpack.c.bf16 %v135_v34, %v134_v33 }
  0xe6   :  { %v128_v38 = vadd.f32 %v338_v36, %v294_v22  ;;  %v119_v39 = vpop.f32.mrb[5].mxu0 }
  0xe7   :  { %v120_v40 = vadd.f32 %v294_v22, %v119_v39  ;;  %v339_v41 = vpop.f32.mrb[6].mxu0  ;;  %356 = vmatprep.mubr.bf16.mxu1 %v142_v37 }
  0xe8   :  { %v131_v42 = vadd.f32 %v339_v41, %v294_v22  ;;  %v122_v43 = vpop.f32.mrb[7].mxu0  ;;  %357 = vmatmul.mubr.bf16.vlgmr.msra.gmra.mrb[0].mxu1 %v143_v35  ;;  %v140_v45 = vmax.f32 %v128_v38, 0.0 }
  0xe9   :  { %v123_v44 = vadd.f32 %v294_v22, %v122_v43  ;;  %v138_v47 = vmax.f32 %v120_v40, 0.0 }
  0xea   :  { %v141_v46 = vmax.f32 %v131_v42, 0.0 }
  0xeb   :  { %v139_v48 = vmax.f32 %v123_v44, 0.0 }
  0xec   :  { %v145_v49 = vpack.c.bf16 %v141_v46, %v140_v45 }
  0xed   :  { %v144_v50 = vpack.c.bf16 %v139_v48, %v138_v47 }
  0xef   :  { %360 = vmatprep.mubr.bf16.mxu1 %v144_v50 }
  0xf0   :  { %361 = vmatmul.mubr.bf16.gmra.mrb[4].mxu1 %v145_v49 }
 0x1bb   :  { %v358_v52 = vpop.f32.mrb[0].mxu1 }
 0x1bc   :  { %v260_v53 = vadd.f32 %v358_v52, %v301_v51  ;;  %v251_v54 = vpop.f32.mrb[1].mxu1 }
 0x1bd   :  { %v252_v55 = vadd.f32 %v301_v51, %v251_v54  ;;  %v359_v56 = vpop.f32.mrb[2].mxu1 }
 0x1be   :  { %284 = vst.msk [vmem:[%s505_s5 + $0x10] sm:$0xff] %vm56_vm0, %v260_v53  ;;  %v263_v57 = vadd.f32 %v359_v56, %v301_v51  ;;  %v254_v58 = vpop.f32.mrb[3].mxu1 }
 0x1bf   :  { %282 = vst.msk [vmem:[%s505_s5] sm:$0xff] %vm56_vm0, %v252_v55  ;;  %v255_v59 = vadd.f32 %v301_v51, %v254_v58 }
 0x1c0   :  { %285 = vst.msk [vmem:[%s505_s5 + $0x18] sm:$0xff] %vm56_vm0, %v263_v57 }
 0x1c1   :  { %283 = vst.msk [vmem:[%s505_s5 + $0x8] sm:$0xff] %vm56_vm0, %v255_v59 }
 0x1c3   :  { %v362_v60 = vpop.f32.mrb[4].mxu1 }
 0x1c4   :  { %v276_v61 = vadd.f32 %v362_v60, %v301_v51  ;;  %v267_v62 = vpop.f32.mrb[5].mxu1 }
 0x1c5   :  { %v268_v63 = vadd.f32 %v301_v51, %v267_v62  ;;  %v363_v0 = vpop.f32.mrb[6].mxu1 }
 0x1c6   :  { %288 = vst.msk [vmem:[%s505_s5 + $0x30] sm:$0xff] %vm56_vm0, %v276_v61  ;;  %v279_v1 = vadd.f32 %v363_v0, %v301_v51  ;;  %v270_v2 = vpop.f32.mrb[7].mxu1 }
 0x1c7   :  { %286 = vst.msk [vmem:[%s505_s5 + $0x20] sm:$0xff] %vm56_vm0, %v268_v63  ;;  %v271_v3 = vadd.f32 %v301_v51, %v270_v2 }
 0x1c8   :  { %289 = vst.msk [vmem:[%s505_s5 + $0x38] sm:$0xff] %vm56_vm0, %v279_v1 }
 0x1c9   :  { %287 = vst.msk [vmem:[%s505_s5 + $0x28] sm:$0xff] %vm56_vm0, %v271_v3 }

</bundles_post_ra>
